<compile_context>
chip_gen: v7x
topology: tpu7x:2x2x1
jax: 0.10.0
libtpu: 0.0.40
codegen_flags: <defaults>
</compile_context>

<pallas_src>
import functools

import jax
import jax.numpy as jnp
from jax.experimental import pallas as pl
from jax.experimental.pallas import tpu as pltpu

_BETA = 1.0 / 9.0

# Max tile sizes (adaptively shrunk to the problem size by _pick_tile).
_MATCH_NONE_TM = 512    # (512, 2048) f32 output tile = 4 MiB -> 8 MiB double-buffered.
_MATCH_NONE_TN = 2048
_MATCH_RED_TM = 256     # reduce path is VPU-bound; 2 MiB working tile is plenty.
_MATCH_RED_TN = 2048
_VEC_TN = 8192          # non-match path: 1-D lane tiles over N.


def _round_up(x, m):
    return ((x + m - 1) // m) * m


def _pick_tile(dim, align, max_tile):
    """Pick a tile (multiple of `align`, <= max_tile) minimizing grid padding.

    Returns (tile, padded_dim).  Exact fit whenever possible; never picks a tile
    smaller than max_tile/4 (avoids pathological per-grid-step overhead).
    """
    d_al = _round_up(max(dim, 1), align)
    if d_al <= max_tile:
        return d_al, d_al                          # single exact-fit tile
    units = d_al // align
    max_units = max(max_tile // align, 1)
    min_units = max(1, max_units // 4)
    best_t, best_pad = max_units, _round_up(units, max_units)
    for t in range(min_units, max_units + 1):
        pad = _round_up(units, t)
        if pad < best_pad or (pad == best_pad and t > best_t):
            best_t, best_pad = t, pad
    return best_t * align, best_pad * align


# ---------------------------------------------------------------------------
# match=False path:  smooth_l1_loss(pred (N,5), target (N,5))
# kernels operate on a single lane-dense (4, N) slab: rows 0-1 pred xy^T, 2-3 target xy^T.
# ---------------------------------------------------------------------------
def _smooth_l1_none_kernel(s_ref, out_ref, *, beta, half_over_beta, half_beta):
    diff = jnp.abs(s_ref[0:2, :] - s_ref[2:4, :])                   # (2, tn)
    elem = jnp.where(diff < beta, half_over_beta * diff * diff, diff - half_beta)
    out_ref[...] = jnp.sum(elem, axis=0, keepdims=True)             # (1, tn) lane-dense


def _smooth_l1_partial_kernel(s_ref, out_ref, *, beta, half_over_beta, half_beta):
    diff = jnp.abs(s_ref[0:2, :] - s_ref[2:4, :])                   # (2, tn)
    elem = jnp.where(diff < beta, half_over_beta * diff * diff, diff - half_beta)
    # Per-tile partial sum; zero padding (pred=target=0) contributes exactly 0 loss.
    out_ref[...] = jnp.sum(elem, keepdims=True).reshape(1, 1, 1)


def smooth_l1_loss_pallas(pred, target, reduction="none", beta=_BETA):
    pred = pred.astype(jnp.float32)
    target = target.astype(jnp.float32)
    n = pred.shape[0]

    tn, n_pad = _pick_tile(n, 128, _VEC_TN)
    grid = (n_pad // tn,)

    # Glue: xy columns only, stacked into one lane-dense (4, N) slab; one pad op.
    slab = jnp.concatenate([pred[:, :2].T, target[:, :2].T], axis=0)     # (4, n)
    if n_pad != n:
        slab = jnp.pad(slab, ((0, 0), (0, n_pad - n)))

    half_over_beta = 0.5 / beta
    half_beta = 0.5 * beta
    in_specs = [pl.BlockSpec((4, tn), lambda i: (0, i))]

    if reduction == "none":
        kernel = functools.partial(_smooth_l1_none_kernel, beta=beta,
                                   half_over_beta=half_over_beta, half_beta=half_beta)
        out = pl.pallas_call(
            kernel,
            out_shape=jax.ShapeDtypeStruct((1, n_pad), jnp.float32),
            grid=grid,
            in_specs=in_specs,
            out_specs=pl.BlockSpec((1, tn), lambda i: (0, i)),
            compiler_params=pltpu.CompilerParams(dimension_semantics=("parallel",)),
        )(slab)
        return out[0, :n]                                            # (N,)

    # sum / mean: per-tile partials on a parallel grid (both TCs on v7x), sum in glue.
    kernel = functools.partial(_smooth_l1_partial_kernel, beta=beta,
                               half_over_beta=half_over_beta, half_beta=half_beta)
    partials = pl.pallas_call(
        kernel,
        out_shape=jax.ShapeDtypeStruct((grid[0], 1, 1), jnp.float32),
        grid=grid,
        in_specs=in_specs,
        out_specs=pl.BlockSpec((1, 1, 1), lambda i: (i, 0, 0)),
        compiler_params=pltpu.CompilerParams(dimension_semantics=("parallel",)),
    )(slab)
    total = jnp.sum(partials)
    if reduction == "mean":
        if n > 0:
            total = total * (1.0 / n)
        else:
            total = total + jnp.float32(float("nan"))   # PyTorch mean of empty -> nan
    return total


# ---------------------------------------------------------------------------
# match=True path:  smooth_l1_match_loss(pred (M,5), target (N,5)) -> (M, N)
# ---------------------------------------------------------------------------
def _match_none_kernel(pred_ref, tgt_ref, out_ref, *, beta, half_over_beta, half_beta):
    px = pred_ref[:, 0:1]                      # (tm, 1)
    py = pred_ref[:, 1:2]
    tx = tgt_ref[0:1, :]                       # (1, tn)
    ty = tgt_ref[1:2, :]
    dist = jnp.abs(px - tx) + jnp.abs(py - ty)                      # (tm, tn)
    out_ref[...] = jnp.where(dist < beta, half_over_beta * dist * dist, dist - half_beta)


def _match_reduce_kernel(pred_ref, tgt_ref, out_ref, *, beta, half_over_beta, half_beta,
                         m, n, tm, tn, mask_rows, mask_cols):
    i = pl.program_id(0)
    j = pl.program_id(1)
    px = pred_ref[:, 0:1]
    py = pred_ref[:, 1:2]
    tx = tgt_ref[0:1, :]
    ty = tgt_ref[1:2, :]
    dist = jnp.abs(px - tx) + jnp.abs(py - ty)
    loss = jnp.where(dist < beta, half_over_beta * dist * dist, dist - half_beta)

    # Per-row-block accumulator: output block depends only on i, so i can be "parallel"
    # (megacore) while j stays "arbitrary" (sequential reduction) without races.
    @pl.when(j == 0)
    def _():
        out_ref[...] = jnp.zeros_like(out_ref)

    if mask_rows or mask_cols:
        # Padding lives only in the last row/col block -> gate masking on edge tiles.
        terms = []
        if mask_rows:
            terms.append(i == pl.num_programs(0) - 1)
        if mask_cols:
            terms.append(j == pl.num_programs(1) - 1)
        edge = terms[0]
        for t in terms[1:]:
            edge = jnp.logical_or(edge, t)

        @pl.when(jnp.logical_not(edge))
        def _():
            out_ref[...] += jnp.sum(loss, keepdims=True).reshape(1, 1, 1)

        @pl.when(edge)
        def _():
            masked = loss
            if mask_rows:     # (tm,1) row mask: one broadcast multiply
                rows = i * tm + jax.lax.broadcasted_iota(jnp.int32, (tm, 1), 0)
                masked = masked * (rows < m).astype(jnp.float32)
            if mask_cols:     # (1,tn) col mask: one broadcast multiply
                cols = j * tn + jax.lax.broadcasted_iota(jnp.int32, (1, tn), 1)
                masked = masked * (cols < n).astype(jnp.float32)
            out_ref[...] += jnp.sum(masked, keepdims=True).reshape(1, 1, 1)
    else:
        out_ref[...] += jnp.sum(loss, keepdims=True).reshape(1, 1, 1)


def smooth_l1_match_loss_pallas(pred, target, reduction="mean", beta=_BETA):
    pred = pred.astype(jnp.float32)
    target = target.astype(jnp.float32)
    m = pred.shape[0]
    n = target.shape[0]

    if reduction == "none":
        max_tm, max_tn = _MATCH_NONE_TM, _MATCH_NONE_TN
    else:
        max_tm, max_tn = _MATCH_RED_TM, _MATCH_RED_TN
    tm, m_pad = _pick_tile(m, 8, max_tm)
    tn, n_pad = _pick_tile(n, 128, max_tn)

    # Glue: xy columns only; pred stays (M, 2) (resident across the N sweep),
    # target transposed to lane-dense (2, N).
    pred_xy = pred[:, :2]
    if m_pad != m:
        pred_xy = jnp.pad(pred_xy, ((0, m_pad - m), (0, 0)))
    tgt_xy_t = target[:, :2].T
    if n_pad != n:
        tgt_xy_t = jnp.pad(tgt_xy_t, ((0, 0), (0, n_pad - n)))

    grid = (m_pad // tm, n_pad // tn)
    half_over_beta = 0.5 / beta
    half_beta = 0.5 * beta
    in_specs = [pl.BlockSpec((tm, 2), lambda i, j: (i, 0)),   # resident across N sweep
                pl.BlockSpec((2, tn), lambda i, j: (0, j))]

    if reduction == "none":
        kernel = functools.partial(_match_none_kernel, beta=beta,
                                   half_over_beta=half_over_beta, half_beta=half_beta)
        cost = pl.CostEstimate(
            flops=9 * m_pad * n_pad, transcendentals=0,
            bytes_accessed=4 * (2 * m_pad + 2 * n_pad + m_pad * n_pad))
        out = pl.pallas_call(
            kernel,
            out_shape=jax.ShapeDtypeStruct((m_pad, n_pad), jnp.float32),
            grid=grid,
            in_specs=in_specs,
            out_specs=pl.BlockSpec((tm, tn), lambda i, j: (i, j)),
            compiler_params=pltpu.CompilerParams(
                dimension_semantics=("parallel", "parallel")),
            cost_estimate=cost,
        )(pred_xy, tgt_xy_t)
        if m_pad == m and n_pad == n:
            return out                                        # exact fit: no slice copy
        return out[:m, :n]                                    # (M, N)

    mask_rows = m_pad != m
    mask_cols = n_pad != n
    kernel = functools.partial(_match_reduce_kernel, beta=beta,
                               half_over_beta=half_over_beta, half_beta=half_beta,
                               m=m, n=n, tm=tm, tn=tn,
                               mask_rows=mask_rows, mask_cols=mask_cols)
    cost = pl.CostEstimate(
        flops=11 * m_pad * n_pad, transcendentals=0,
        bytes_accessed=4 * (2 * m_pad + 2 * n_pad + grid[0]))
    partials = pl.pallas_call(
        kernel,
        out_shape=jax.ShapeDtypeStruct((grid[0], 1, 1), jnp.float32),
        grid=grid,
        in_specs=in_specs,
        out_specs=pl.BlockSpec((1, 1, 1), lambda i, j: (i, 0, 0)),
        compiler_params=pltpu.CompilerParams(
            dimension_semantics=("parallel", "arbitrary")),
        cost_estimate=cost,
    )(pred_xy, tgt_xy_t)
    total = jnp.sum(partials)
    if reduction == "mean":
        denom = m * n
        if denom > 0:
            total = total * (1.0 / denom)
        else:
            total = total + jnp.float32(float("nan"))  # PyTorch mean of empty -> nan
    return total


# ---------------------------------------------------------------------------
# Module wrapper (mirrors the PyTorch SmoothLoss)
# ---------------------------------------------------------------------------
class SmoothLoss:
    def __init__(self, reduction="mean", match=False):
        self.reduction = reduction
        self.match = match

    def __call__(self, pred, target):
        if self.match:
            return smooth_l1_match_loss_pallas(pred, target, reduction=self.reduction)
        return smooth_l1_loss_pallas(pred, target, reduction=self.reduction)


# ---------------------------------------------------------------------------
# Pure-JAX references (correctness check only)
# ---------------------------------------------------------------------------
def _ref_smooth_l1(pred, target, reduction, beta=_BETA):
    diff = jnp.abs(pred[:, :2] - target[:, :2])
    loss = jnp.where(diff < beta, 0.5 * diff * diff / beta, diff - 0.5 * beta).sum(-1)
    if reduction == "mean":
        return loss.mean()
    if reduction == "sum":
        return loss.sum()
    return loss


def _ref_smooth_l1_match(pred, target, reduction, beta=_BETA):
    p = pred[:, :2]
    t = target[:, :2]
    dist = jnp.sum(jnp.abs(p[:, None, :] - t[None, :, :]), axis=-1)
    loss = jnp.where(dist < beta, 0.5 * dist * dist / beta, dist - 0.5 * beta)
    if reduction == "mean":
        return loss.mean()
    if reduction == "sum":
        return loss.sum()
    return loss


if __name__ == "__main__":
    key = jax.random.PRNGKey(0)
    k1, k2, k3, k4 = jax.random.split(key, 4)

    # (rows, 5) bboxes normalized to [0, 1): small shapes.
    pred = jax.random.uniform(k1, (8, 5), dtype=jnp.float32)
    target = jax.random.uniform(k2, (8, 5), dtype=jnp.float32)
    target_m = jax.random.uniform(k3, (6, 5), dtype=jnp.float32)
    pred_ragged = jax.random.uniform(k4, (10, 5), dtype=jnp.float32)  # exercises row masking

    # --- match=False ---
    loss_mean = SmoothLoss(reduction="mean", match=False)(pred, target)
    jax.block_until_ready(loss_mean)
    assert jnp.allclose(loss_mean, _ref_smooth_l1(pred, target, "mean"), atol=1e-6)

    loss_sum = SmoothLoss(reduction="sum", match=False)(pred, target)
    jax.block_until_ready(loss_sum)
    assert jnp.allclose(loss_sum, _ref_smooth_l1(pred, target, "sum"), atol=1e-6)

    loss_none = SmoothLoss(reduction="none", match=False)(pred, target)
    jax.block_until_ready(loss_none)
    assert loss_none.shape == (8,)
    assert jnp.allclose(loss_none, _ref_smooth_l1(pred, target, "none"), atol=1e-6)

    # --- match=True ---
    loss_match_mean = SmoothLoss(reduction="mean", match=True)(pred, target_m)
    jax.block_until_ready(loss_match_mean)
    assert jnp.allclose(
        loss_match_mean, _ref_smooth_l1_match(pred, target_m, "mean"), atol=1e-6
    )

    loss_match_sum = SmoothLoss(reduction="sum", match=True)(pred_ragged, target_m)
    jax.block_until_ready(loss_match_sum)
    assert jnp.allclose(
        loss_match_sum, _ref_smooth_l1_match(pred_ragged, target_m, "sum"), atol=1e-6
    )

    loss_match_none = SmoothLoss(reduction="none", match=True)(pred, target_m)
    jax.block_until_ready(loss_match_none)
    assert loss_match_none.shape == (8, 6)
    assert jnp.allclose(
        loss_match_none, _ref_smooth_l1_match(pred, target_m, "none"), atol=1e-6
    )

    print("KERNEL_OK")
</pallas_src>

<mosaic_0001>
module attributes {stable_mosaic.version = 11 : i64} {
  func.func @_smooth_l1_partial_kernel(%arg0: i32, %arg1: memref<4x128xf32, #tpu.memory_space<vmem>>, %arg2: memref<1x1x1xf32, #tpu.memory_space<vmem>>) attributes {dimension_semantics = [#tpu.dimension_semantics<parallel>], iteration_bounds = array<i64: 1>, scalar_prefetch = 0 : i64, scratch_operands = 0 : i64, tpu.core_type = #tpu.core_type<tc>, window_params = [{transform_indices = @transform_0, window_bounds = array<i64: 4, 128>}, {transform_indices = @transform_1, window_bounds = array<i64: 1, 1, 1>}]} {
    %c0 = arith.constant 0 : index
    %c0_0 = arith.constant 0 : index
    %0 = vector.load %arg1[%c0, %c0_0] : memref<4x128xf32, #tpu.memory_space<vmem>>, vector<2x128xf32>
    %c2 = arith.constant 2 : index
    %c0_1 = arith.constant 0 : index
    %1 = vector.load %arg1[%c2, %c0_1] : memref<4x128xf32, #tpu.memory_space<vmem>>, vector<2x128xf32>
    %2 = arith.subf %0, %1 : vector<2x128xf32>
    %3 = math.absf %2 : vector<2x128xf32>
    %cst = arith.constant 0.111111112 : f32
    %4 = vector.broadcast %cst : f32 to vector<2x128xf32>
    %5 = arith.cmpf olt, %3, %4 : vector<2x128xf32>
    %cst_2 = arith.constant 4.500000e+00 : f32
    %6 = vector.broadcast %cst_2 : f32 to vector<2x128xf32>
    %7 = arith.mulf %6, %3 : vector<2x128xf32>
    %8 = arith.mulf %7, %3 : vector<2x128xf32>
    %cst_3 = arith.constant 0.055555556 : f32
    %9 = vector.broadcast %cst_3 : f32 to vector<2x128xf32>
    %10 = arith.subf %3, %9 : vector<2x128xf32>
    %11 = arith.select %5, %8, %10 : vector<2x128xi1>, vector<2x128xf32>
    %12 = vector.shape_cast %11 : vector<2x128xf32> to vector<1x2x128xf32>
    %cst_4 = arith.constant dense<0.000000e+00> : vector<1xf32>
    %13 = vector.multi_reduction <add>, %12, %cst_4 [1, 2] : vector<1x2x128xf32> to vector<1xf32>
    %14 = vector.shape_cast %13 : vector<1xf32> to vector<1x1x1xf32>
    %15 = vector.extract %14[0, 0, 0] : f32 from vector<1x1x1xf32>
    %16 = vector.broadcast %15 : f32 to vector<1x1xf32>
    %17 = vector.shape_cast %16 : vector<1x1xf32> to vector<1x1x1xf32>
    %c0_5 = arith.constant 0 : index
    %c0_6 = arith.constant 0 : index
    %c0_7 = arith.constant 0 : index
    %18 = vector.load %arg2[%c0_5, %c0_6, %c0_7] : memref<1x1x1xf32, #tpu.memory_space<vmem>>, vector<1x1x1xf32>
    tpu.vector_store %arg2[%c0_5, %c0_6, %c0_7], %17 {strides = array<i32>} : memref<1x1x1xf32, #tpu.memory_space<vmem>>, vector<1x1x1xf32>,
    return
  }
  func.func @transform_0(%arg0: i32) -> (i32, i32) {
    %c0_i32 = arith.constant 0 : i32
    %c0_i32_0 = arith.constant 0 : i32
    return %c0_i32, %arg0 : i32, i32
  }
  func.func @transform_1(%arg0: i32) -> (i32, i32, i32) {
    %c0_i32 = arith.constant 0 : i32
    %c0_i32_0 = arith.constant 0 : i32
    %c0_i32_1 = arith.constant 0 : i32
    return %arg0, %c0_i32, %c0_i32_0 : i32, i32, i32
  }
}

</mosaic_0001>

<bundles_post_ra>
// kernel: tpu_custom_call.1
= control target key start
LH: loop header
LB: loop body
LE: loop exit
PB: predicated region body
PF: predicated region fallthrough
CT: control target
= control target key end

     0   :  { %6 = vsyncpa [#allocation3], 0  ;;  %s148_s0 = inlined_call_operand.hbm [shape: f32[4,128], index: 0, kind: input, shape index: {}]   ;;  %s149_s1 = inlined_call_operand.hbm [shape: f32[1,1,1], index: 1, kind: output, shape index: {}]  }
   0x1   :  { %7 = vsyncpa [#allocation4], 0  ;;  %s112_s6 = smov [#allocation2]   ;;  %s64_s10 = scalar_lea.hbm %s148_s0, 64 }
   0x2   :  { %s14_s7 = sshll.u32 %s112_s6, 4  ;;  %p65_p0 = scmp.ne.s32.totalorder %s148_s0, %s64_s10  ;;  %s15_s7 = int_to_ptr.vmem [resolvable:$true] %s14_s7 }
   0x3   :  { %p68_p1 = scmp.lt.u32.totalorder %s64_s10, %s148_s0 }
   0x5   :  { %p70_p2 = pnand %p68_p1, %p65_p0 }
   0x7   :  { %73 = shalt.err (!%p70_p2)
}
   0x8   :  { %s74_s15 = scalar_lea.vmem %s15_s7, 64  ;;  %p79_p4 = scmp.lt.s32.totalorder %s15_s7, %s15_s7 }
   0x9   :  { %p75_p3 = scmp.ne.s32.totalorder %s15_s7, %s74_s15  ;;  %p80_p5 = scmp.lt.s32.totalorder %s74_s15, %s74_s15 }
   0xb   :  { %p81_p6 = por %p80_p5, %p79_p4 }
   0xd   :  { %p82_p7 = pnand %p81_p6, %p75_p3 }
   0xf   :  { %85 = shalt.err (!%p82_p7)
}
  0x10   :  { %17 = dma.hbm_to_vmem [thread:$0]  %s148_s0, 64, %s15_s7, [#allocation3]  }
  0x11   :  { %108 = dma.done.wait [#allocation3], 64  }
  0x12   :  { %109 = vsyncadd [#allocation3], 4294967232  ;;  %v21_v0 = vld [vmem:[#allocation2] sm:$0x3]  ;;  %v22_v1 = vld [vmem:[#allocation2 + $0x2] sm:$0x3] }
  0x13   :  { %v23_v2 = vsub.f32 %v21_v0, %v22_v1  ;;  %vm30_vm1 = vcmask 1041408   ;;  %s113_s0 = smov [#allocation5]   ;;  %vm42_vm2 = vcmask 0  }
  0x14   :  { %s50_s18 = sshll.u32 %s113_s0, 4  ;;  %s51_s18 = int_to_ptr.vmem [resolvable:$true] %s50_s18 }
  0x15   :  { %v24_v3 = vand.u32 2147483647, %v23_v2  ;;  %s86_s20 = scalar_lea.vmem %s51_s18, 16  ;;  %s90_s21 = scalar_lea.vmem %s51_s18, 32 }
  0x16   :  { %p87_p8 = scmp.ne.s32.totalorder %s51_s18, %s86_s20  ;;  %p91_p9 = scmp.lt.s32.totalorder %s51_s18, %s51_s18 }
  0x17   :  { %v26_v4 = vmul.f32 4.5, %v24_v3  ;;  %v59_v5 = vadd.f32 -0.055555556, %v24_v3  ;;  %vm25_vm0 = vcmp.lt.f32.partialorder %v24_v3, 0.11111111  ;;  %p92_p10 = scmp.lt.s32.totalorder %s90_s21, %s86_s20 }
  0x19   :  { %v27_v6 = vmul.f32 %v26_v4, %v24_v3  ;;  %p93_p11 = por %p92_p10, %p91_p9 }
  0x1b   :  { %v29_v7 = vsel %vm25_vm0, %v27_v6, %v59_v5  ;;  %p94_p12 = pnand %p93_p11, %p87_p8 }
  0x1c   :  { %v31_v8 = vsel %vm30_vm1, %v29_v7, 0.0 }
  0x1d   :  { %32 = vadd.xlane.f32.xlu0 %v31_v8 }
  0xaa   :  { %v33_v9 = vpop.xlane.xlu0 %32 }
  0xab   :  { %v34_v10 = vrot.slane %v33_v9, 4 }
  0xad   :  { %v35_v11 = vadd.f32 %v34_v10, %v33_v9 }
  0xaf   :  { %v36_v12 = vrot.slane %v35_v11, 2 }
  0xb1   :  { %v37_v13 = vadd.f32 %v36_v12, %v35_v11 }
  0xb3   :  { %v38_v14 = vrot.slane %v37_v13, 1 }
  0xb5   :  { %v39_v15 = vadd.f32 %v38_v14, %v37_v13 }
  0xb7   :  { %60 = vpush %v39_v15 }
  0xe8   :  { %s61_s19 = spop %60 }
  0xe9   :  { %v41_v16 = vstv %s61_s19 }
  0xea   :  { %43 = vst.msk [vmem:[#allocation5] sm:$0x1] %vm42_vm2, %v41_v16 }
  0xeb   :  { %97 = shalt.err (!%p94_p12)
}
  0xec   :  { %s98_s24 = scalar_lea.hbm %s149_s1, 16 }
  0xed   :  { %p99_p13 = scmp.ne.s32.totalorder %s149_s1, %s98_s24  ;;  %p102_p0 = scmp.lt.u32.totalorder %s98_s24, %s149_s1 }
  0xef   :  { %p104_p1 = pnand %p102_p0, %p99_p13 }
  0xf1   :  { %107 = shalt.err (!%p104_p1)
}
  0xf2   :  { %53 = dma.vmem_to_hbm [thread:$0]  %s51_s18, 16, %s149_s1, [#allocation4]  }
  0xf3   :  { %110 = dma.done.wait [#allocation4], 16  }
  0xf4   :  { %111 = vsyncadd [#allocation4], 4294967280 }
  0xf5   :  { %57 = vsyncpa [#allocation3], 1 }
  0xf6   :  { %58 = vsyncpa [#allocation4], 1 }

</bundles_post_ra>
